<compile_context>
chip_gen: v7x
topology: tpu7x:2x2x1
jax: 0.10.0
libtpu: 0.0.40
codegen_flags: <defaults>
</compile_context>

<pallas_src>
import functools
import math

import jax
import jax.numpy as jnp
from jax.experimental import pallas as pl
from jax.experimental.pallas import tpu as pltpu

NEG = -1.0e30  # effective -inf that stays finite through exp/log


# ----------------------------------------------------------------------------
# Kernel 1: label smoothing loss -> per-row KL sums (reduced in the wrapper)
# ----------------------------------------------------------------------------
def _ls_kernel(x_ref, tgt_ref, out_ref, *, size, padding_idx, smoothing):
    x = x_ref[...].astype(jnp.float32)          # (Tr, C)
    tgt = tgt_ref[...]                          # (Tr, 1) int32

    # log_softmax along the class dim
    m = jnp.max(x, axis=1, keepdims=True)
    lse = m + jnp.log(jnp.sum(jnp.exp(x - m), axis=1, keepdims=True))
    logp = x - lse

    conf = 1.0 - smoothing
    low = smoothing / (size - 1)
    # guard smoothing in {0, 1}: target==0 entries contribute exactly 0 to KL
    log_conf = math.log(conf) if conf > 0.0 else 0.0
    log_low = math.log(low) if low > 0.0 else 0.0

    col = jax.lax.broadcasted_iota(jnp.int32, x.shape, 1)   # (Tr, C)
    ignore = tgt == padding_idx                             # (Tr, 1) bool
    tgt_eff = jnp.where(ignore, 0, tgt)
    hit = col == tgt_eff

    # KLDivLoss(reduction='none'): target * (log(target) - input)
    kl = jnp.where(hit, conf * (log_conf - logp), low * (log_low - logp))
    kl = jnp.where(ignore, 0.0, kl)

    out_ref[...] = jnp.sum(kl, axis=1, keepdims=True)       # (Tr, 1) partial sums


def label_smoothing_loss(att_x, att_target, *, size, padding_idx,
                         smoothing=0.1, normalize_length=False, row_tile=256):
    B, SL, C = att_x.shape
    assert C == size
    x = att_x.reshape(-1, C)                    # keep dtype; upcast in-kernel
    tgt = att_target.reshape(-1).astype(jnp.int32)

    R = x.shape[0]
    Tr = max(8, min(row_tile, ((R + 7) // 8) * 8))
    R_pad = ((R + Tr - 1) // Tr) * Tr
    if R_pad != R:
        x = jnp.pad(x, ((0, R_pad - R), (0, 0)))
        tgt = jnp.pad(tgt, (0, R_pad - R), constant_values=padding_idx)
    tgt2 = tgt.reshape(R_pad, 1)

    kern = functools.partial(_ls_kernel, size=size, padding_idx=padding_idx,
                             smoothing=smoothing)
    row_sums = pl.pallas_call(
        kern,
        out_shape=jax.ShapeDtypeStruct((R_pad, 1), jnp.float32),
        grid=(R_pad // Tr,),
        in_specs=[pl.BlockSpec((Tr, C), lambda i: (i, 0)),
                  pl.BlockSpec((Tr, 1), lambda i: (i, 0))],
        out_specs=pl.BlockSpec((Tr, 1), lambda i: (i, 0)),
        compiler_params=pltpu.CompilerParams(dimension_semantics=("parallel",)),
    )(x, tgt2)

    total = jnp.sum(row_sums)                   # tree-sum of per-row partials
    if normalize_length:
        denom = jnp.sum(att_target.reshape(-1) != padding_idx).astype(jnp.float32)
    else:
        denom = jnp.float32(B)
    return total / denom


# ----------------------------------------------------------------------------
# Kernel 2a: CTC emission gather  E[t, n, s] = logp[t, n, ext[n, s]]
#   grid = (example, T-chunk); one-hot built once per example (VMEM scratch)
# ----------------------------------------------------------------------------
def _ctc_emit_kernel(logp_ref, ext_ref, e_ref, oh_ref):
    @pl.when(pl.program_id(1) == 0)
    def _build_onehot():
        C = logp_ref.shape[1]
        S = ext_ref.shape[1]
        c_iota = jax.lax.broadcasted_iota(jnp.int32, (C, S), 0)
        oh_ref[...] = (c_iota == ext_ref[...]).astype(jnp.float32)   # (C, S)

    e_ref[...] = jnp.dot(logp_ref[...].astype(jnp.float32), oh_ref[...],
                         preferred_element_type=jnp.float32)          # (tc, S)


# ----------------------------------------------------------------------------
# Kernel 2b: CTC forward DP, batched over Nt examples per grid step
# ----------------------------------------------------------------------------
def _ctc_dp_kernel(tmax_ref, e_ref, skip_ref, xlen_ref, tlen_ref, out_ref):
    b = pl.program_id(0)
    Nt, S = skip_ref.shape

    skip = skip_ref[...] > 0                    # (Nt, S) bool
    xlen = xlen_ref[...]                        # (Nt, 1) int32
    sn = 2 * tlen_ref[...] + 1                  # (Nt, 1) int32, extended length
    lane = jax.lax.broadcasted_iota(jnp.int32, (Nt, S), 1)

    # t = 0: alpha[0] = e[0, blank], alpha[1] = e[0, label_0]
    e0 = e_ref[0]                               # (Nt, S)
    alpha0 = jnp.where(lane < jnp.minimum(sn, 2), e0, NEG)

    def body(t, alpha):
        a1 = jnp.where(lane >= 1, pltpu.roll(alpha, 1, axis=1), NEG)   # alpha[s-1]
        a2 = jnp.where(skip, pltpu.roll(alpha, 2, axis=1), NEG)        # alpha[s-2]
        m = jnp.maximum(jnp.maximum(alpha, a1), a2)
        se = jnp.exp(alpha - m) + jnp.exp(a1 - m) + jnp.exp(a2 - m)
        new = m + jnp.log(se) + e_ref[t]
        return jnp.where(t < xlen, new, alpha)  # per-example length masking

    # only run up to the longest sequence in this chunk
    alpha = jax.lax.fori_loop(1, tmax_ref[b], body, alpha0)

    # loss_n = -logsumexp(alpha[S_n-1], alpha[S_n-2])
    l1 = jnp.max(jnp.where(lane == sn - 1, alpha, NEG), axis=1, keepdims=True)
    l2 = jnp.max(jnp.where((lane == sn - 2) & (sn >= 2), alpha, NEG),
                 axis=1, keepdims=True)
    m2 = jnp.maximum(l1, l2)
    loss = -(m2 + jnp.log(jnp.exp(l1 - m2) + jnp.exp(l2 - m2)))
    loss = jnp.where(loss > 1.0e29, 0.0, loss)  # zero_infinity=True (sentinel check)
    loss = jnp.where(xlen > 0, loss, 0.0)       # padded batch rows contribute 0
    out_ref[...] = loss                          # (Nt, 1)


def ctc_loss_sum(ctc_x, ctc_target, x_length, target_length, *, blank,
                 batch_tile=8, time_tile=256):
    T, N, C = ctc_x.shape
    L_max = ctc_target.shape[1]
    S = ((2 * L_max + 1 + 127) // 128) * 128    # lane-pad extended length

    # batch chunking for the DP kernel
    if N <= batch_tile:
        Nt, N_pad = N, N
    else:
        Nt = batch_tile
        N_pad = ((N + Nt - 1) // Nt) * Nt
    nb = N_pad // Nt

    # time chunking for the emission-gather kernel (bounded VMEM per step)
    tc = T
    for cand in (512, 256, 128, 64, 32, 16, 8):
        if cand <= time_tile and cand <= T and T % cand == 0:
            tc = cand
            break
    n_t = T // tc

    # extended target sequence: blank, y1, blank, y2, ..., yL, blank (pad w/ blank)
    tgt = ctc_target.astype(jnp.int32)
    ext = jnp.full((N, S), blank, dtype=jnp.int32)
    ext = ext.at[:, 1:2 * L_max + 1:2].set(tgt)
    s_idx = jnp.arange(S, dtype=jnp.int32)[None, :]
    ext_m2 = jnp.concatenate([jnp.full((N, 2), -1, jnp.int32), ext[:, :-2]], axis=1)
    skip = ((s_idx >= 2) & (ext != blank) & (ext != ext_m2)).astype(jnp.int32)
    xlen = jnp.minimum(x_length.astype(jnp.int32), T)
    tlen = jnp.minimum(target_length.astype(jnp.int32), L_max)

    if N_pad != N:
        pad = N_pad - N
        ext = jnp.pad(ext, ((0, pad), (0, 0)), constant_values=blank)
        skip = jnp.pad(skip, ((0, pad), (0, 0)))
        xlen = jnp.pad(xlen, (0, pad))
        tlen = jnp.pad(tlen, (0, pad))

    tmax = jnp.max(xlen.reshape(nb, Nt), axis=1).astype(jnp.int32)   # (nb,)

    # --- kernel 2a: emission gather (no HBM transpose of ctc_x; only cheap
    #     metadata reshape to add a unit axis for the squeezed block spec) ---
    logp4 = ctc_x.astype(jnp.float32).reshape(T, N, 1, C)
    ext3 = ext.reshape(N_pad, 1, S)
    emissions = pl.pallas_call(
        _ctc_emit_kernel,
        out_shape=jax.ShapeDtypeStruct((T, N_pad, 1, S), jnp.float32),
        grid=(N_pad, n_t),
        in_specs=[
            # clamp n so padded batch rows re-read a valid example
            pl.BlockSpec((tc, None, None, C),
                         lambda n, t: (t, jnp.minimum(n, N - 1), 0, 0)),
            pl.BlockSpec((None, 1, S), lambda n, t: (n, 0, 0)),
        ],
        out_specs=pl.BlockSpec((tc, None, None, S), lambda n, t: (t, n, 0, 0)),
        scratch_shapes=[pltpu.VMEM((C, S), jnp.float32)],   # cached one-hot
        compiler_params=pltpu.CompilerParams(
            dimension_semantics=("parallel", "arbitrary")),
    )(logp4, ext3)

    # --- kernel 2b: batched alpha recursion ---
    e3 = emissions.reshape(T, N_pad, S)
    per_ex = pl.pallas_call(
        _ctc_dp_kernel,
        out_shape=jax.ShapeDtypeStruct((N_pad, 1), jnp.float32),
        grid=(nb,),
        in_specs=[
            pl.BlockSpec(memory_space=pltpu.MemorySpace.SMEM),     # per-chunk max T
            pl.BlockSpec((T, Nt, S), lambda b: (0, b, 0)),         # emissions
            pl.BlockSpec((Nt, S), lambda b: (b, 0)),               # skip mask (int)
            pl.BlockSpec((Nt, 1), lambda b: (b, 0)),               # x lengths
            pl.BlockSpec((Nt, 1), lambda b: (b, 0)),               # target lengths
        ],
        out_specs=pl.BlockSpec((Nt, 1), lambda b: (b, 0)),
        compiler_params=pltpu.CompilerParams(dimension_semantics=("parallel",)),
    )(tmax, e3, skip, xlen.reshape(N_pad, 1), tlen.reshape(N_pad, 1))

    return jnp.sum(per_ex[:N, 0])


# ----------------------------------------------------------------------------
# AttentionJointCTC forward
# ----------------------------------------------------------------------------
def attention_joint_ctc(att_x, att_target, ctc_x, ctc_target, x_length,
                        target_length, *, size, padding_idx, ctc_weight=0.3,
                        smoothing=0.1, normalize_length=False):
    att_loss = label_smoothing_loss(att_x, att_target, size=size,
                                    padding_idx=padding_idx,
                                    smoothing=smoothing,
                                    normalize_length=normalize_length)
    N = ctc_x.shape[1]
    ctc_loss = ctc_loss_sum(ctc_x, ctc_target, x_length, target_length,
                            blank=padding_idx) / jnp.float32(N)
    return (1.0 - ctc_weight) * att_loss + ctc_weight * ctc_loss


# ----------------------------------------------------------------------------
# Pure-JAX reference (independent shift mechanics) for validation
# ----------------------------------------------------------------------------
def _reference_joint(att_x, att_target, ctc_x, ctc_target, x_length,
                     target_length, *, size, padding_idx, ctc_weight,
                     smoothing, normalize_length):
    # label smoothing
    B, SL, C = att_x.shape
    x = att_x.reshape(-1, C).astype(jnp.float32)
    t = att_target.reshape(-1)
    logp = jax.nn.log_softmax(x, axis=1)
    conf = 1.0 - smoothing
    low = smoothing / (size - 1)
    ignore = t == padding_idx
    teff = jnp.where(ignore, 0, t)
    true_dist = jnp.full_like(logp, low).at[jnp.arange(x.shape[0]), teff].set(conf)
    kl = true_dist * (jnp.log(true_dist) - logp)
    kl = jnp.where(ignore[:, None], 0.0, kl)
    denom = jnp.sum(~ignore) if normalize_length else B
    att_loss = jnp.sum(kl) / denom

    # CTC forward algorithm (log-space), reduction='sum', zero_infinity
    T, N, C = ctc_x.shape
    L = ctc_target.shape[1]
    S = 2 * L + 1
    neg = -1.0e30
    ext = jnp.full((N, S), padding_idx, jnp.int32).at[:, 1::2].set(
        ctc_target.astype(jnp.int32))
    em = jnp.take_along_axis(ctc_x.astype(jnp.float32),
                             jnp.broadcast_to(ext[None], (T, N, S)), axis=2)
    sidx = jnp.arange(S)[None, :]
    extm2 = jnp.concatenate([jnp.full((N, 2), -1, jnp.int32), ext[:, :-2]], axis=1)
    skip = (sidx >= 2) & (ext != padding_idx) & (ext != extm2)
    sn = 2 * target_length.astype(jnp.int32)[:, None] + 1
    xl = x_length.astype(jnp.int32)[:, None]
    alpha = jnp.where(sidx < jnp.minimum(sn, 2), em[0], neg)

    def step(t_, alpha):
        a1 = jnp.concatenate([jnp.full((N, 1), neg), alpha[:, :-1]], axis=1)
        a2 = jnp.where(skip,
                       jnp.concatenate([jnp.full((N, 2), neg), alpha[:, :-2]],
                                       axis=1), neg)
        m = jnp.maximum(jnp.maximum(alpha, a1), a2)
        new = m + jnp.log(jnp.exp(alpha - m) + jnp.exp(a1 - m) + jnp.exp(a2 - m)) + em[t_]
        return jnp.where(t_ < xl, new, alpha)

    alpha = jax.lax.fori_loop(1, T, step, alpha)
    l1 = jnp.max(jnp.where(sidx == sn - 1, alpha, neg), axis=1)
    l2 = jnp.max(jnp.where((sidx == sn - 2) & (sn >= 2), alpha, neg), axis=1)
    m2 = jnp.maximum(l1, l2)
    loss = -(m2 + jnp.log(jnp.exp(l1 - m2) + jnp.exp(l2 - m2)))
    loss = jnp.where(loss > 1.0e29, 0.0, loss)
    ctc_loss = jnp.sum(loss) / N
    return (1.0 - ctc_weight) * att_loss + ctc_weight * ctc_loss


if __name__ == "__main__":
    key = jax.random.PRNGKey(0)
    B, SL, V = 2, 8, 128          # batch, decoder seq len, vocab (= `size`)
    T, L = 16, 6                  # CTC time steps, max target length
    pad_idx = 0

    k1, k2, k3, k4 = jax.random.split(key, 4)
    att_x = jax.random.normal(k1, (B, SL, V), dtype=jnp.float32)
    att_target = jax.random.randint(k2, (B, SL), 1, V).astype(jnp.int32)
    att_target = att_target.at[0, SL - 2:].set(pad_idx)     # some padded labels

    # nn.CTCLoss expects log-probs of shape (T, N, C)
    ctc_logits = jax.random.normal(k3, (T, B, V), dtype=jnp.float32)
    ctc_x = jax.nn.log_softmax(ctc_logits, axis=-1)
    ctc_target = jax.random.randint(k4, (B, L), 1, V).astype(jnp.int32)
    x_length = jnp.array([T, T - 4], dtype=jnp.int32)
    target_length = jnp.array([L, L - 2], dtype=jnp.int32)

    joint = jax.jit(functools.partial(
        attention_joint_ctc, size=V, padding_idx=pad_idx,
        ctc_weight=0.3, smoothing=0.1, normalize_length=False))
    loss = jax.block_until_ready(joint(att_x, att_target, ctc_x, ctc_target,
                                       x_length, target_length))

    ref = _reference_joint(att_x, att_target, ctc_x, ctc_target, x_length,
                           target_length, size=V, padding_idx=pad_idx,
                           ctc_weight=0.3, smoothing=0.1, normalize_length=False)

    assert jnp.isfinite(loss), "loss is not finite"
    assert jnp.allclose(loss, ref, rtol=2e-3, atol=2e-2), (float(loss), float(ref))
    print("KERNEL_OK")
</pallas_src>

<mosaic_0001>
module attributes {stable_mosaic.version = 11 : i64} {
  func.func @_ctc_emit_kernel(%arg0: i32, %arg1: i32, %arg2: memref<16x1x1x128xf32, #tpu.memory_space<vmem>>, %arg3: memref<1x1x128xi32, #tpu.memory_space<vmem>>, %arg4: memref<16x1x1x128xf32, #tpu.memory_space<vmem>>, %arg5: memref<128x128xf32, #tpu.memory_space<vmem>>) attributes {dimension_semantics = [#tpu.dimension_semantics<parallel>, #tpu.dimension_semantics<arbitrary>], iteration_bounds = array<i64: 2, 1>, scalar_prefetch = 0 : i64, scratch_operands = 1 : i64, tpu.core_type = #tpu.core_type<tc>, window_params = [{transform_indices = @transform_0, window_bounds = array<i64: 16, 1, 1, 128>}, {transform_indices = @transform_1, window_bounds = array<i64: 1, 1, 128>}, {transform_indices = @transform_2, window_bounds = array<i64: 16, 1, 1, 128>}]} {
    %c0_i32 = arith.constant 0 : i32
    %0 = arith.cmpi eq, %arg1, %c0_i32 : i32
    %1 = arith.extui %0 : i1 to i32
    %c0_i32_0 = arith.constant 0 : i32
    %2 = arith.cmpi ne, %1, %c0_i32_0 : i32
    scf.if %2 {
      %10 = tpu.iota {dimensions = array<i32: 0>} : vector<128x128xi32>
      %c0_10 = arith.constant 0 : index
      %c0_11 = arith.constant 0 : index
      %c0_12 = arith.constant 0 : index
      %11 = vector.load %arg3[%c0_10, %c0_11, %c0_12] : memref<1x1x128xi32, #tpu.memory_space<vmem>>, vector<1x1x128xi32>
      %12 = vector.shape_cast %11 : vector<1x1x128xi32> to vector<1x128xi32>
      %13 = vector.broadcast %12 : vector<1x128xi32> to vector<128x128xi32>
      %14 = arith.cmpi eq, %10, %13 : vector<128x128xi32>
      %15 = arith.extui %14 : vector<128x128xi1> to vector<128x128xi32>
      %16 = arith.sitofp %15 : vector<128x128xi32> to vector<128x128xf32>
      %c0_13 = arith.constant 0 : index
      %c0_14 = arith.constant 0 : index
      %17 = vector.load %arg5[%c0_13, %c0_14] : memref<128x128xf32, #tpu.memory_space<vmem>>, vector<128x128xf32>
      tpu.vector_store %arg5[%c0_13, %c0_14], %16 {strides = array<i32>} : memref<128x128xf32, #tpu.memory_space<vmem>>, vector<128x128xf32>,
    } else {
    }
    %c0 = arith.constant 0 : index
    %c0_1 = arith.constant 0 : index
    %c0_2 = arith.constant 0 : index
    %c0_3 = arith.constant 0 : index
    %3 = vector.load %arg2[%c0, %c0_1, %c0_2, %c0_3] : memref<16x1x1x128xf32, #tpu.memory_space<vmem>>, vector<16x1x1x128xf32>
    %4 = vector.shape_cast %3 : vector<16x1x1x128xf32> to vector<16x128xf32>
    %c0_4 = arith.constant 0 : index
    %c0_5 = arith.constant 0 : index
    %5 = vector.load %arg5[%c0_4, %c0_5] : memref<128x128xf32, #tpu.memory_space<vmem>>, vector<128x128xf32>
    %cst = arith.constant dense<0.000000e+00> : vector<16x128xf32>
    %6 = tpu.matmul %4, %5, %cst {dimension_numbers = #tpu.dot_dimension_numbers<[1], [0], [0], [1], [0, 0, 1, 1], [], []>} : vector<16x128xf32>, vector<128x128xf32>, vector<16x128xf32> -> vector<16x128xf32>
    %c0_6 = arith.constant 0 : index
    %c0_7 = arith.constant 0 : index
    %c0_8 = arith.constant 0 : index
    %c0_9 = arith.constant 0 : index
    %7 = vector.load %arg4[%c0_6, %c0_7, %c0_8, %c0_9] : memref<16x1x1x128xf32, #tpu.memory_space<vmem>>, vector<16x1x1x128xf32>
    %8 = vector.shape_cast %7 : vector<16x1x1x128xf32> to vector<16x128xf32>
    %9 = vector.shape_cast %6 : vector<16x128xf32> to vector<16x1x1x128xf32>
    tpu.vector_store %arg4[%c0_6, %c0_7, %c0_8, %c0_9], %9 {strides = array<i32>} : memref<16x1x1x128xf32, #tpu.memory_space<vmem>>, vector<16x1x1x128xf32>,
    return
  }
  func.func @transform_0(%arg0: i32, %arg1: i32) -> (i32, i32, i32, i32) {
    %c1_i32 = arith.constant 1 : i32
    %0 = arith.minsi %arg0, %c1_i32 : i32
    %c0_i32 = arith.constant 0 : i32
    %c0_i32_0 = arith.constant 0 : i32
    %c0_i32_1 = arith.constant 0 : i32
    return %arg1, %0, %c0_i32, %c0_i32_0 : i32, i32, i32, i32
  }
  func.func @transform_1(%arg0: i32, %arg1: i32) -> (i32, i32, i32) {
    %c0_i32 = arith.constant 0 : i32
    %c0_i32_0 = arith.constant 0 : i32
    %c0_i32_1 = arith.constant 0 : i32
    return %arg0, %c0_i32, %c0_i32_0 : i32, i32, i32
  }
  func.func @transform_2(%arg0: i32, %arg1: i32) -> (i32, i32, i32, i32) {
    %c0_i32 = arith.constant 0 : i32
    %c0_i32_0 = arith.constant 0 : i32
    %c0_i32_1 = arith.constant 0 : i32
    return %arg1, %arg0, %c0_i32, %c0_i32_0 : i32, i32, i32, i32
  }
}

module attributes {stable_mosaic.version = 11 : i64} {
  func.func @_ctc_dp_kernel(%arg0: i32, %arg1: memref<1xi32, #tpu.memory_space<smem>>, %arg2: memref<16x2x128xf32, #tpu.memory_space<vmem>>, %arg3: memref<2x128xi32, #tpu.memory_space<vmem>>, %arg4: memref<2x1xi32, #tpu.memory_space<vmem>>, %arg5: memref<2x1xi32, #tpu.memory_space<vmem>>, %arg6: memref<2x1xf32, #tpu.memory_space<vmem>>) attributes {dimension_semantics = [#tpu.dimension_semantics<parallel>], iteration_bounds = array<i64: 1>, scalar_prefetch = 0 : i64, scratch_operands = 0 : i64, tpu.core_type = #tpu.core_type<tc>, window_params = [{transform_indices = @transform_0, window_bounds = array<i64: 1>}, {transform_indices = @transform_1, window_bounds = array<i64: 16, 2, 128>}, {transform_indices = @transform_2, window_bounds = array<i64: 2, 128>}, {transform_indices = @transform_3, window_bounds = array<i64: 2, 1>}, {transform_indices = @transform_4, window_bounds = array<i64: 2, 1>}, {transform_indices = @transform_5, window_bounds = array<i64: 2, 1>}]} {
    %c0 = arith.constant 0 : index
    %c0_0 = arith.constant 0 : index
    %0 = vector.load %arg3[%c0, %c0_0] : memref<2x128xi32, #tpu.memory_space<vmem>>, vector<2x128xi32>
    %c0_i32 = arith.constant 0 : i32
    %1 = vector.broadcast %c0_i32 : i32 to vector<2x128xi32>
    %2 = arith.cmpi sgt, %0, %1 : vector<2x128xi32>
    %c0_1 = arith.constant 0 : index
    %c0_2 = arith.constant 0 : index
    %3 = vector.load %arg4[%c0_1, %c0_2] : memref<2x1xi32, #tpu.memory_space<vmem>>, vector<2x1xi32>
    %c0_3 = arith.constant 0 : index
    %c0_4 = arith.constant 0 : index
    %4 = vector.load %arg5[%c0_3, %c0_4] : memref<2x1xi32, #tpu.memory_space<vmem>>, vector<2x1xi32>
    %c2_i32 = arith.constant 2 : i32
    %5 = vector.broadcast %c2_i32 : i32 to vector<2x1xi32>
    %6 = arith.muli %5, %4 : vector<2x1xi32>
    %c1_i32 = arith.constant 1 : i32
    %7 = vector.broadcast %c1_i32 : i32 to vector<2x1xi32>
    %8 = arith.addi %6, %7 : vector<2x1xi32>
    %9 = tpu.iota {dimensions = array<i32: 1>} : vector<2x128xi32>
    %c0_5 = arith.constant 0 : index
    %c0_6 = arith.constant 0 : index
    %c0_7 = arith.constant 0 : index
    %10 = vector.load %arg2[%c0_5, %c0_6, %c0_7] : memref<16x2x128xf32, #tpu.memory_space<vmem>>, vector<1x2x128xf32>
    %11 = vector.shape_cast %10 : vector<1x2x128xf32> to vector<2x128xf32>
    %c2_i32_8 = arith.constant 2 : i32
    %12 = vector.broadcast %c2_i32_8 : i32 to vector<2x1xi32>
    %13 = arith.minsi %8, %12 : vector<2x1xi32>
    %14 = vector.broadcast %13 : vector<2x1xi32> to vector<2x128xi32>
    %15 = arith.cmpi slt, %9, %14 : vector<2x128xi32>
    %cst = arith.constant -1.000000e+30 : f32
    %16 = vector.broadcast %cst : f32 to vector<2x128xf32>
    %17 = arith.select %15, %11, %16 : vector<2x128xi1>, vector<2x128xf32>
    %18 = arith.index_cast %arg0 : i32 to index
    %19 = memref.load %arg1[%18] : memref<1xi32, #tpu.memory_space<smem>>
    %c1_i32_9 = arith.constant 1 : i32
    %20 = arith.subi %19, %c1_i32_9 : i32
    %21 = arith.addi %c1_i32_9, %20 : i32
    %c1_i32_10 = arith.constant 1 : i32
    %22 = scf.for %arg7 = %c1_i32_9 to %21 step %c1_i32_10 iter_args(%arg8 = %17) -> (vector<2x128xf32>)  : i32 {
      %c1_i32_25 = arith.constant 1 : i32
      %62 = vector.broadcast %c1_i32_25 : i32 to vector<2x128xi32>
      %63 = arith.cmpi sge, %9, %62 : vector<2x128xi32>
      %c1_i32_26 = arith.constant 1 : i32
      %64 = tpu.dynamic_rotate %arg8 by %c1_i32_26 dim 1 : vector<2x128xf32>, i32 -> vector<2x128xf32>
      %cst_27 = arith.constant -1.000000e+30 : f32
      %65 = vector.broadcast %cst_27 : f32 to vector<2x128xf32>
      %66 = arith.select %63, %64, %65 : vector<2x128xi1>, vector<2x128xf32>
      %c2_i32_28 = arith.constant 2 : i32
      %67 = tpu.dynamic_rotate %arg8 by %c2_i32_28 dim 1 : vector<2x128xf32>, i32 -> vector<2x128xf32>
      %cst_29 = arith.constant -1.000000e+30 : f32
      %68 = vector.broadcast %cst_29 : f32 to vector<2x128xf32>
      %69 = arith.select %2, %67, %68 : vector<2x128xi1>, vector<2x128xf32>
      %70 = arith.maximumf %arg8, %66 : vector<2x128xf32>
      %71 = arith.maximumf %70, %69 : vector<2x128xf32>
      %72 = arith.subf %arg8, %71 : vector<2x128xf32>
      %73 = math.exp %72 : vector<2x128xf32>
      %74 = arith.subf %66, %71 : vector<2x128xf32>
      %75 = math.exp %74 : vector<2x128xf32>
      %76 = arith.addf %73, %75 : vector<2x128xf32>
      %77 = arith.subf %69, %71 : vector<2x128xf32>
      %78 = math.exp %77 : vector<2x128xf32>
      %79 = arith.addf %76, %78 : vector<2x128xf32>
      %80 = math.log %79 : vector<2x128xf32>
      %81 = arith.addf %71, %80 : vector<2x128xf32>
      %82 = arith.index_cast %arg7 : i32 to index
      %c0_30 = arith.constant 0 : index
      %c0_31 = arith.constant 0 : index
      %83 = vector.load %arg2[%82, %c0_30, %c0_31] : memref<16x2x128xf32, #tpu.memory_space<vmem>>, vector<1x2x128xf32>
      %84 = vector.shape_cast %83 : vector<1x2x128xf32> to vector<2x128xf32>
      %85 = arith.addf %81, %84 : vector<2x128xf32>
      %86 = vector.broadcast %arg7 : i32 to vector<2x1xi32>
      %87 = arith.cmpi slt, %86, %3 : vector<2x1xi32>
      %88 = vector.shape_cast %87 : vector<2x1xi1> to vector<2x1xi1>
      %89 = vector.broadcast %88 : vector<2x1xi1> to vector<2x128xi1>
      %90 = arith.select %89, %85, %arg8 : vector<2x128xi1>, vector<2x128xf32>
      scf.yield %90 : vector<2x128xf32>
    }
    %c1_i32_11 = arith.constant 1 : i32
    %23 = vector.broadcast %c1_i32_11 : i32 to vector<2x1xi32>
    %24 = arith.subi %8, %23 : vector<2x1xi32>
    %25 = vector.broadcast %24 : vector<2x1xi32> to vector<2x128xi32>
    %26 = arith.cmpi eq, %9, %25 : vector<2x128xi32>
    %cst_12 = arith.constant -1.000000e+30 : f32
    %27 = vector.broadcast %cst_12 : f32 to vector<2x128xf32>
    %28 = arith.select %26, %22, %27 : vector<2x128xi1>, vector<2x128xf32>
    %cst_13 = arith.constant dense<0xFF800000> : vector<2xf32>
    %29 = vector.multi_reduction <maximumf>, %28, %cst_13 [1] : vector<2x128xf32> to vector<2xf32>
    %30 = vector.shape_cast %29 : vector<2xf32> to vector<2x1xf32>
    %c2_i32_14 = arith.constant 2 : i32
    %31 = vector.broadcast %c2_i32_14 : i32 to vector<2x1xi32>
    %32 = arith.subi %8, %31 : vector<2x1xi32>
    %33 = vector.broadcast %32 : vector<2x1xi32> to vector<2x128xi32>
    %34 = arith.cmpi eq, %9, %33 : vector<2x128xi32>
    %c2_i32_15 = arith.constant 2 : i32
    %35 = vector.broadcast %c2_i32_15 : i32 to vector<2x1xi32>
    %36 = arith.cmpi sge, %8, %35 : vector<2x1xi32>
    %37 = vector.broadcast %36 : vector<2x1xi1> to vector<2x128xi1>
    %38 = arith.andi %34, %37 : vector<2x128xi1>
    %cst_16 = arith.constant -1.000000e+30 : f32
    %39 = vector.broadcast %cst_16 : f32 to vector<2x128xf32>
    %40 = arith.select %38, %22, %39 : vector<2x128xi1>, vector<2x128xf32>
    %cst_17 = arith.constant dense<0xFF800000> : vector<2xf32>
    %41 = vector.multi_reduction <maximumf>, %40, %cst_17 [1] : vector<2x128xf32> to vector<2xf32>
    %42 = vector.shape_cast %41 : vector<2xf32> to vector<2x1xf32>
    %43 = arith.maximumf %30, %42 : vector<2x1xf32>
    %44 = arith.subf %30, %43 : vector<2x1xf32>
    %45 = math.exp %44 : vector<2x1xf32>
    %46 = arith.subf %42, %43 : vector<2x1xf32>
    %47 = math.exp %46 : vector<2x1xf32>
    %48 = arith.addf %45, %47 : vector<2x1xf32>
    %49 = math.log %48 : vector<2x1xf32>
    %50 = arith.addf %43, %49 : vector<2x1xf32>
    %cst_18 = arith.constant 0.000000e+00 : f32
    %51 = vector.broadcast %cst_18 : f32 to vector<2x1xf32>
    %52 = arith.subf %51, %50 : vector<2x1xf32>
    %cst_19 = arith.constant 1.000000e+29 : f32
    %53 = vector.broadcast %cst_19 : f32 to vector<2x1xf32>
    %54 = arith.cmpf ogt, %52, %53 : vector<2x1xf32>
    %cst_20 = arith.constant 0.000000e+00 : f32
    %55 = vector.broadcast %cst_20 : f32 to vector<2x1xf32>
    %56 = arith.select %54, %55, %52 : vector<2x1xi1>, vector<2x1xf32>
    %c0_i32_21 = arith.constant 0 : i32
    %57 = vector.broadcast %c0_i32_21 : i32 to vector<2x1xi32>
    %58 = arith.cmpi sgt, %3, %57 : vector<2x1xi32>
    %cst_22 = arith.constant 0.000000e+00 : f32
    %59 = vector.broadcast %cst_22 : f32 to vector<2x1xf32>
    %60 = arith.select %58, %56, %59 : vector<2x1xi1>, vector<2x1xf32>
    %c0_23 = arith.constant 0 : index
    %c0_24 = arith.constant 0 : index
    %61 = vector.load %arg6[%c0_23, %c0_24] : memref<2x1xf32, #tpu.memory_space<vmem>>, vector<2x1xf32>
    tpu.vector_store %arg6[%c0_23, %c0_24], %60 {strides = array<i32>} : memref<2x1xf32, #tpu.memory_space<vmem>>, vector<2x1xf32>,
    return
  }
  func.func @transform_0(%arg0: i32) -> i32 {
    %c0_i32 = arith.constant 0 : i32
    %c0_i32_0 = arith.constant 0 : i32
    return %c0_i32 : i32
  }
  func.func @transform_1(%arg0: i32) -> (i32, i32, i32) {
    %c0_i32 = arith.constant 0 : i32
    %c0_i32_0 = arith.constant 0 : i32
    %c0_i32_1 = arith.constant 0 : i32
    return %c0_i32, %arg0, %c0_i32_0 : i32, i32, i32
  }
  func.func @transform_2(%arg0: i32) -> (i32, i32) {
    %c0_i32 = arith.constant 0 : i32
    %c0_i32_0 = arith.constant 0 : i32
    return %arg0, %c0_i32 : i32, i32
  }
  func.func @transform_3(%arg0: i32) -> (i32, i32) {
    %c0_i32 = arith.constant 0 : i32
    %c0_i32_0 = arith.constant 0 : i32
    return %arg0, %c0_i32 : i32, i32
  }
  func.func @transform_4(%arg0: i32) -> (i32, i32) {
    %c0_i32 = arith.constant 0 : i32
    %c0_i32_0 = arith.constant 0 : i32
    return %arg0, %c0_i32 : i32, i32
  }
  func.func @transform_5(%arg0: i32) -> (i32, i32) {
    %c0_i32 = arith.constant 0 : i32
    %c0_i32_0 = arith.constant 0 : i32
    return %arg0, %c0_i32 : i32, i32
  }
}

module attributes {stable_mosaic.version = 11 : i64} {
  func.func @_ls_kernel(%arg0: i32, %arg1: memref<16x128xf32, #tpu.memory_space<vmem>>, %arg2: memref<16x1xi32, #tpu.memory_space<vmem>>, %arg3: memref<16x1xf32, #tpu.memory_space<vmem>>) attributes {dimension_semantics = [#tpu.dimension_semantics<parallel>], iteration_bounds = array<i64: 1>, scalar_prefetch = 0 : i64, scratch_operands = 0 : i64, tpu.core_type = #tpu.core_type<tc>, window_params = [{transform_indices = @transform_0, window_bounds = array<i64: 16, 128>}, {transform_indices = @transform_1, window_bounds = array<i64: 16, 1>}, {transform_indices = @transform_2, window_bounds = array<i64: 16, 1>}]} {
    %c0 = arith.constant 0 : index
    %c0_0 = arith.constant 0 : index
    %0 = vector.load %arg1[%c0, %c0_0] : memref<16x128xf32, #tpu.memory_space<vmem>>, vector<16x128xf32>
    %c0_1 = arith.constant 0 : index
    %c0_2 = arith.constant 0 : index
    %1 = vector.load %arg2[%c0_1, %c0_2] : memref<16x1xi32, #tpu.memory_space<vmem>>, vector<16x1xi32>
    %cst = arith.constant dense<0xFF800000> : vector<16xf32>
    %2 = vector.multi_reduction <maximumf>, %0, %cst [1] : vector<16x128xf32> to vector<16xf32>
    %3 = vector.shape_cast %2 : vector<16xf32> to vector<16x1xf32>
    %4 = vector.broadcast %3 : vector<16x1xf32> to vector<16x128xf32>
    %5 = arith.subf %0, %4 : vector<16x128xf32>
    %6 = math.exp %5 : vector<16x128xf32>
    %cst_3 = arith.constant dense<0.000000e+00> : vector<16xf32>
    %7 = vector.multi_reduction <add>, %6, %cst_3 [1] : vector<16x128xf32> to vector<16xf32>
    %8 = vector.shape_cast %7 : vector<16xf32> to vector<16x1xf32>
    %9 = math.log %8 : vector<16x1xf32>
    %10 = arith.addf %3, %9 : vector<16x1xf32>
    %11 = vector.broadcast %10 : vector<16x1xf32> to vector<16x128xf32>
    %12 = arith.subf %0, %11 : vector<16x128xf32>
    %13 = tpu.iota {dimensions = array<i32: 1>} : vector<16x128xi32>
    %c0_i32 = arith.constant 0 : i32
    %14 = vector.broadcast %c0_i32 : i32 to vector<16x1xi32>
    %15 = arith.cmpi eq, %1, %14 : vector<16x1xi32>
    %c0_i32_4 = arith.constant 0 : i32
    %16 = vector.broadcast %c0_i32_4 : i32 to vector<16x1xi32>
    %17 = arith.select %15, %16, %1 : vector<16x1xi1>, vector<16x1xi32>
    %18 = vector.broadcast %17 : vector<16x1xi32> to vector<16x128xi32>
    %19 = arith.cmpi eq, %13, %18 : vector<16x128xi32>
    %cst_5 = arith.constant -0.105360515 : f32
    %20 = vector.broadcast %cst_5 : f32 to vector<16x128xf32>
    %21 = arith.subf %20, %12 : vector<16x128xf32>
    %cst_6 = arith.constant 0.899999976 : f32
    %22 = vector.broadcast %cst_6 : f32 to vector<16x128xf32>
    %23 = arith.mulf %22, %21 : vector<16x128xf32>
    %cst_7 = arith.constant -7.14677238 : f32
    %24 = vector.broadcast %cst_7 : f32 to vector<16x128xf32>
    %25 = arith.subf %24, %12 : vector<16x128xf32>
    %cst_8 = arith.constant 7.87401571E-4 : f32
    %26 = vector.broadcast %cst_8 : f32 to vector<16x128xf32>
    %27 = arith.mulf %26, %25 : vector<16x128xf32>
    %28 = arith.select %19, %23, %27 : vector<16x128xi1>, vector<16x128xf32>
    %cst_9 = arith.constant 0.000000e+00 : f32
    %29 = vector.shape_cast %15 : vector<16x1xi1> to vector<16x1xi1>
    %30 = vector.broadcast %29 : vector<16x1xi1> to vector<16x128xi1>
    %31 = vector.broadcast %cst_9 : f32 to vector<16x128xf32>
    %32 = arith.select %30, %31, %28 : vector<16x128xi1>, vector<16x128xf32>
    %cst_10 = arith.constant dense<0.000000e+00> : vector<16xf32>
    %33 = vector.multi_reduction <add>, %32, %cst_10 [1] : vector<16x128xf32> to vector<16xf32>
    %34 = vector.shape_cast %33 : vector<16xf32> to vector<16x1xf32>
    %c0_11 = arith.constant 0 : index
    %c0_12 = arith.constant 0 : index
    %35 = vector.load %arg3[%c0_11, %c0_12] : memref<16x1xf32, #tpu.memory_space<vmem>>, vector<16x1xf32>
    tpu.vector_store %arg3[%c0_11, %c0_12], %34 {strides = array<i32>} : memref<16x1xf32, #tpu.memory_space<vmem>>, vector<16x1xf32>,
    return
  }
  func.func @transform_0(%arg0: i32) -> (i32, i32) {
    %c0_i32 = arith.constant 0 : i32
    %c0_i32_0 = arith.constant 0 : i32
    return %arg0, %c0_i32 : i32, i32
  }
  func.func @transform_1(%arg0: i32) -> (i32, i32) {
    %c0_i32 = arith.constant 0 : i32
    %c0_i32_0 = arith.constant 0 : i32
    return %arg0, %c0_i32 : i32, i32
  }
  func.func @transform_2(%arg0: i32) -> (i32, i32) {
    %c0_i32 = arith.constant 0 : i32
    %c0_i32_0 = arith.constant 0 : i32
    return %arg0, %c0_i32 : i32, i32
  }
}

</mosaic_0001>

<bundles_post_ra>
// kernel: attention_joint_ctc.3
= control target key start
LH: loop header
LB: loop body
LE: loop exit
PB: predicated region body
PF: predicated region fallthrough
CT: control target
= control target key end

     0   :  { %v93_v1 = vmov 0   ;;  %v37_v21 = vlaneseq  ;;  %vm75_vm6 = vcmask 7168   ;;  %s127_s0 = inlined_call_operand.vmem [shape: f32[16,128], index: 0, kind: input, shape index: {}]   ;;  %s128_s1 = inlined_call_operand.vmem [shape: s32[16,1], index: 1, kind: input, shape index: {}]   ;;  %s129_s2 = inlined_call_operand.vmem [shape: f32[16,1], index: 2, kind: output, shape index: {}]  }
   0x1   :  { %v11_v0 = vld [vmem:[%s127_s0] sm:$0xff]  ;;  %84 = vset.pattern.permute.xlu1 %v93_v1  ;;  %v14_v2 = vld [vmem:[%s128_s1 + $0x8] sm:$0xff]  ;;  %83 = vset.pattern.permute.xlu0 %v93_v1 }
   0x2   :  { %15 = vmax.xlane.f32.xlu0 %v11_v0  ;;  %45 = vperm.xlu1 %84, %v14_v2   ;;  %v13_v3 = vld [vmem:[%s128_s1] sm:$0xff]  ;;  %v12_v4 = vld [vmem:[%s127_s0 + $0x8] sm:$0xff]  ;;  %vm40_vm1 = vcmp.eq.s32.totalorder %v14_v2, 0  ;;  %v38_v27 = vand.u32 127, %v37_v21 }
   0x3   :  { %vm39_vm0 = vcmp.eq.s32.totalorder %v13_v3, 0  ;;  %v60_v6 = vsel %vm40_vm1, 1, %v93_v1 }
   0x4   :  { %v59_v5 = vsel %vm39_vm0, 1, %v93_v1 }
   0x6   :  { %17 = vmax.xlane.f32.xlu0 %v12_v4  ;;  %62 = vperm.xlu1 %84, %v59_v5  }
  0x1c   :  { %42 = vperm.xlu0 %83, %v13_v3  }
  0x81   :  { %v46_v15 = vpop.permute.xlu1 %45 }
  0x82   :  { %vm48_vm4 = vcmp.eq.s32.totalorder %v38_v27, %v46_v15 }
  0x85   :  { %v63_v16 = vpop.permute.xlu1 %62 }
  0x86   :  { %vm67_vm3 = vcmp.eq.s32.totalorder %v63_v16, 1 }
  0x8f   :  { %v16_v7 = vpop.xlane.xlu0 %15 }
  0x90   :  { %v19_v8 = vsub.f32 %v11_v0, %v16_v7 }
  0x92   :  { %v21_v9 = vmul.f32 1.442695, %v19_v8 }
  0x93   :  { %v18_v10 = vpop.xlane.xlu0 %17 }
  0x94   :  { %85 = vpow2.f32 %v21_v9  ;;  %v20_v11 = vsub.f32 %v12_v4, %v18_v10 }
  0x96   :  { %v23_v12 = vmul.f32 1.442695, %v20_v11 }
  0x98   :  { %87 = vpow2.f32 %v23_v12 }
  0x9b   :  { %v43_v26 = vpop.permute.xlu0 %42 }
  0x9c   :  { %vm47_vm2 = vcmp.eq.s32.totalorder %v38_v27, %v43_v26 }
  0x9e   :  { %v86_v13 = vpop.eup %85 }
  0x9f   :  { %25 = vadd.xlane.f32.xlu1 %v86_v13 }
  0xa2   :  { %v88_v14 = vpop.eup %87 }
  0xa3   :  { %27 = vadd.xlane.f32.xlu1 %v88_v14 }
  0xb4   :  { %65 = vperm.xlu1 %84, %v60_v6  }
 0x12c   :  { %v26_v17 = vpop.xlane.xlu1 %25 }
 0x12d   :  { %89 = vlog2.f32 %v26_v17 }
 0x130   :  { %v28_v18 = vpop.xlane.xlu1 %27 }
 0x131   :  { %91 = vlog2.f32 %v28_v18 }
 0x134   :  { %v66_v37 = vpop.permute.xlu1 %65 }
 0x135   :  { %vm68_vm5 = vcmp.eq.s32.totalorder %v66_v37, 1 }
 0x137   :  { %v90_v19 = vpop.eup %89 }
 0x138   :  { %v30_v20 = vmul.f32 0.6931472, %v90_v19 }
 0x13a   :  { %v33_v22 = vadd.f32 %v30_v20, %v16_v7 }
 0x13b   :  { %v92_v23 = vpop.eup %91 }
 0x13c   :  { %v35_v24 = vsub.f32 %v11_v0, %v33_v22  ;;  %v32_v25 = vmul.f32 0.6931472, %v92_v23 }
 0x13e   :  { %v34_v28 = vadd.f32 %v32_v25, %v18_v10  ;;  %v49_v29 = vsub.f32 -0.105360515, %v35_v24  ;;  %v53_v30 = vsub.f32 -7.1467724, %v35_v24 }
 0x140   :  { %v36_v31 = vsub.f32 %v12_v4, %v34_v28  ;;  %v51_v32 = vmul.f32 0.9, %v49_v29  ;;  %v55_v33 = vmul.f32 0.0007874016, %v53_v30 }
 0x142   :  { %v57_v34 = vsel %vm47_vm2, %v51_v32, %v55_v33  ;;  %v50_v35 = vsub.f32 -0.105360515, %v36_v31  ;;  %v54_v36 = vsub.f32 -7.1467724, %v36_v31 }
 0x143   :  { %v69_v38 = vsel %vm67_vm3, 0.0, %v57_v34 }
 0x144   :  { %71 = vadd.xlane.f32.xlu1 %v69_v38  ;;  %v52_v39 = vmul.f32 0.9, %v50_v35  ;;  %v56_v40 = vmul.f32 0.0007874016, %v54_v36 }
 0x146   :  { %v58_v41 = vsel %vm48_vm4, %v52_v39, %v56_v40 }
 0x147   :  { %v70_v42 = vsel %vm68_vm5, 0.0, %v58_v41 }
 0x148   :  { %73 = vadd.xlane.f32.xlu0 %v70_v42 }
 0x1d1   :  { %v72_v43 = vpop.xlane.xlu1 %71 }
 0x1d2   :  { %76 = vst.msk [vmem:[%s129_s2] sm:$0xff] %vm75_vm6, %v72_v43 }
 0x1d5   :  { %v74_v44 = vpop.xlane.xlu0 %73 }
 0x1d6   :  { %77 = vst.msk [vmem:[%s129_s2 + $0x8] sm:$0xff] %vm75_vm6, %v74_v44 }

// kernel: attention_joint_ctc.5
= control target key start
LH: loop header
LB: loop body
LE: loop exit
PB: predicated region body
PF: predicated region fallthrough
CT: control target
= control target key end

     0   :  { %v211_v0 = vmov 0   ;;  %v27_v7 = vlaneseq  ;;  %s311_s4 = inlined_call_operand.vmem [shape: s32[2,1], index: 4, kind: input, shape index: {}]   ;;  %s312_s2 = inlined_call_operand.vmem [shape: s32[2,128], index: 2, kind: input, shape index: {}]   ;;  %s313_s3 = inlined_call_operand.vmem [shape: s32[2,1], index: 3, kind: input, shape index: {}]   ;;  %s314_s0 = inlined_call_operand.<no memory space> [shape: s32[1], index: 0, kind: input, shape index: {}]   ;;  %s315_s5 = inlined_call_operand.vmem [shape: f32[2,1], index: 5, kind: output, shape index: {}]   ;;  %s316_s1 = inlined_call_operand.vmem [shape: f32[16,2,128], index: 1, kind: input, shape index: {}]  }
   0x1   :  { %168 = vset.pattern.permute.xlu0 %v211_v0  ;;  %v249_v1 = vld [vmem:[%s311_s4] sm:$0x3]  ;;  %p137_p0 = scmp.le.s32.totalorder %s314_s0, 1 }
   0x2   :  { %v25_v2 = vmul.u32 2, %v249_v1  ;;  %v261_v5 = vld [vmem:[%s312_s2] sm:$0x3]  ;;  %v269_v8 = vand.u32 127, %v27_v7 }
   0x3   :  { %vm22_vm1 = vcmp.gt.s32.totalorder %v261_v5, 0  ;;  %v267_v6 = vld [vmem:[%s313_s3] sm:$0x3]  ;;  %s278_s3 = smov (!%p137_p0), 1  }
   0x4   :  { %v254_v3 = vadd.s32 1, %v25_v2  ;;  %v29_v9 = vld [vmem:[%s316_s1] sm:$0x3] }
   0x6   :  { %vm30_vm0 = vcmp.lt.s32.totalorder %v254_v3, 2 }
   0x7   :  { %v31_v4 = vsel %vm30_vm0, %v254_v3, 2 }
   0x8   :  { %33 = vperm.xlu0 %168, %v31_v4  }
  0x84   :  { %132 = sbr.rel (%p137_p0) target bundleno = 302 (0x12e), region = 42 }
  0x87   :  { %v34_v10 = vpop.permute.xlu0 %33 }
  0x88   :  { %vm35_vm2 = vcmp.lt.s32.totalorder %v269_v8, %v34_v10 }
  0x89   :  { %v36_v11 = vsel %vm35_vm2, %v29_v9, -1e+30  }
  0x8a   :  { %v207_v12 = vmov %v36_v11   ;;  %v199_v13 = vmov (!%p137_p0), %v36_v11  }
  0x8b LB: > { %v212_v14 = vmov 0   ;;  %s213_s26 = smov 1   ;;  %v72_v15 = vstv %s205_s3  ;;  %s214_s27 = smov 2   ;;  %vm45_vm4 = vcmp.ge.s32.totalorder %v269_v8, 1  ;;  %s205_s3 = sphi %s278_s3, %s41_s3   ;;  %v201_v13 = vphi %v199_v13, %v200_v13  }
  0x8c   : > { %169 = vset.pattern.permute.xlu1 %v212_v14  ;;  %170 = vset.pattern.permute.xlu0 %v212_v14  ;;  %vm73_vm3 = vcmp.lt.s32.totalorder %v72_v15, %v267_v6  ;;  %s138_s28 = sshll.u32 %s205_s3, 1  ;;  %s41_s3 = sadd.s32 1, %s205_s3  }
  0x8d   : > { %46 = vrot.lane.b32.xlu0 %v201_v13, %s213_s26  ;;  %v74_v16 = vsel %vm73_vm3, 1, %v212_v14  ;;  %s69_s6 = scalar_lea.vmem %s316_s1, %s138_s28  ;;  %p40_p1 = scmp.ge.s32.totalorder %s41_s3, %s314_s0 }
  0x8e   : > { %76 = vperm.xlu1 %169, %v74_v16   ;;  %v70_v37 = vld [vmem:[%s69_s6] sm:$0x3] }
  0x91   : > { %49 = vrot.lane.b32.xlu0 %v201_v13, %s214_s27 }
  0xff   : > { %v47_v17 = vpop.permute.xlu0 %46 }
 0x100   : > { %v48_v18 = vsel %vm45_vm4, %v47_v17, -1e+30 }
 0x101   : > { %v52_v19 = vmax.f32 %v201_v13, %v48_v18 }
 0x103   : > { %v50_v20 = vpop.permute.xlu0 %49 }
 0x104   : > { %v51_v21 = vsel %vm22_vm1, %v50_v20, -1e+30 }
 0x105   : > { %v53_v22 = vmax.f32 %v52_v19, %v51_v21 }
 0x107   : > { %v54_v23 = vsub.f32 %v201_v13, %v53_v22  ;;  %v57_v24 = vsub.f32 %v48_v18, %v53_v22  ;;  %v61_v25 = vsub.f32 %v51_v21, %v53_v22 }
 0x109   : > { %v55_v26 = vmul.f32 1.442695, %v54_v23  ;;  %v58_v27 = vmul.f32 1.442695, %v57_v24  ;;  %v62_v28 = vmul.f32 1.442695, %v61_v25 }
 0x10b   : > { %171 = vpow2.f32 %v55_v26 }
 0x10c   : > { %173 = vpow2.f32 %v58_v27 }
 0x10d   : > { %175 = vpow2.f32 %v62_v28  ;;  %v77_v35 = vpop.permute.xlu1 %76 }
 0x10e   : > { %vm78_vm5 = vcmp.eq.s32.totalorder %v77_v35, 1 }
 0x115   : > { %v172_v29 = vpop.eup %171 }
 0x116   : > { %v174_v30 = vpop.eup %173 }
 0x117   : > { %v60_v31 = vadd.f32 %v174_v30, %v172_v29  ;;  %v176_v32 = vpop.eup %175 }
 0x119   : > { %v64_v33 = vadd.f32 %v176_v32, %v60_v31 }
 0x11b   : > { %177 = vlog2.f32 %v64_v33 }
 0x125   : > { %v178_v34 = vpop.eup %177 }
 0x126   : > { %v66_v36 = vmul.f32 0.6931472, %v178_v34 }
 0x127   :  { %43 = sbr.rel (!%p40_p1) target bundleno = 139 (0x8b), region = 48 }
 0x128   : > { %v67_v38 = vadd.f32 %v66_v36, %v53_v22 }
 0x12a   : > { %v71_v39 = vadd.f32 %v70_v37, %v67_v38 }
 0x12c   : > { %v79_v40 = vsel %vm78_vm5, %v71_v39, %v201_v13  }
 0x12d   : > { %v200_v13 = vmov %v79_v40   ;;  %v208_v12 = vmov (%p40_p1), %v79_v40  }
 0x12e PF:  { %179 = vset.pattern.permute.xlu0 %v211_v0  ;;  %v139_v41 = vadd.s32 4294967294, %v254_v3  ;;  %180 = vset.pattern.permute.xlu1 %v211_v0  ;;  %vm94_vm6 = vcmp.ge.s32.totalorder %v254_v3, 2  ;;  %vm85_vm7 = vcmask 1041408   ;;  %vm119_vm12 = vcmp.gt.s32.totalorder %v267_v6, 0  ;;  %v209_v12 = vphi %v207_v12, %v208_v12  }
 0x12f   :  { %81 = vperm.xlu1 %180, %v25_v2   ;;  %v95_v42 = vsel %vm94_vm6, 1, %v211_v0  ;;  %vm121_vm13 = vcmask 1024  }
 0x130   :  { %91 = vperm.xlu0 %179, %v139_v41  }
 0x134   :  { %97 = vperm.xlu0 %179, %v95_v42  }
 0x1ae   :  { %v82_v43 = vpop.permute.xlu1 %81 }
 0x1af   :  { %v92_v44 = vpop.permute.xlu0 %91  ;;  %vm83_vm8 = vcmp.eq.s32.totalorder %v269_v8, %v82_v43 }
 0x1b0   :  { %v84_v45 = vsel %vm83_vm8, %v209_v12, -1e+30  ;;  %vm93_vm9 = vcmp.eq.s32.totalorder %v269_v8, %v92_v44 }
 0x1b1   :  { %v86_v46 = vsel %vm85_vm7, %v84_v45, -inf }
 0x1b2   :  { %87 = vmax.xlane.f32.xlu1 %v86_v46 }
 0x1b3   :  { %v98_v47 = vpop.permute.xlu0 %97 }
 0x1b4   :  { %vm99_vm10 = vcmp.eq.s32.totalorder %v98_v47, 1 }
 0x1b5   :  { %vm100_vm11 = vmand %vm93_vm9, %vm99_vm10 }
 0x1b6   :  { %v101_v48 = vsel %vm100_vm11, %v209_v12, -1e+30 }
 0x1b7   :  { %v102_v49 = vsel %vm85_vm7, %v101_v48, -inf }
 0x1b8   :  { %103 = vmax.xlane.f32.xlu0 %v102_v49 }
 0x23f   :  { %v88_v50 = vpop.xlane.xlu1 %87 }
 0x245   :  { %v104_v51 = vpop.xlane.xlu0 %103 }
 0x246   :  { %v105_v52 = vmax.f32 %v88_v50, %v104_v51 }
 0x248   :  { %v106_v53 = vsub.f32 %v88_v50, %v105_v52  ;;  %v109_v54 = vsub.f32 %v104_v51, %v105_v52 }
 0x24a   :  { %v107_v55 = vmul.f32 1.442695, %v106_v53  ;;  %v110_v56 = vmul.f32 1.442695, %v109_v54 }
 0x24c   :  { %181 = vpow2.f32 %v107_v55 }
 0x24d   :  { %183 = vpow2.f32 %v110_v56 }
 0x256   :  { %v182_v57 = vpop.eup %181 }
 0x257   :  { %v184_v58 = vpop.eup %183 }
 0x258   :  { %v112_v59 = vadd.f32 %v184_v58, %v182_v57 }
 0x25a   :  { %185 = vlog2.f32 %v112_v59 }
 0x264   :  { %v186_v60 = vpop.eup %185 }
 0x265   :  { %v114_v61 = vmul.f32 0.6931472, %v186_v60 }
 0x267   :  { %v115_v62 = vadd.f32 %v114_v61, %v105_v52 }
 0x269   :  { %v116_v63 = vsub.f32 0.0, %v115_v62 }
 0x26b   :  { %vm117_vm14 = vcmp.gt.f32.partialorder %v116_v63, 1e+29 }
 0x26c   :  { %v118_v0 = vsel %vm117_vm14, 0.0, %v116_v63 }
 0x26d   :  { %v120_v1 = vsel %vm119_vm12, %v118_v0, 0.0 }
 0x26e   :  { %122 = vst.msk [vmem:[%s315_s5] sm:$0x3] %vm121_vm13, %v120_v1 }

// kernel: attention_joint_ctc.4
= control target key start
LH: loop header
LB: loop body
LE: loop exit
PB: predicated region body
PF: predicated region fallthrough
CT: control target
= control target key end

     0   :  { %s1180_s9 = smov 0   ;;  %s1182_s10 = smov 0   ;;  %s1492_s0 = inlined_call_operand.vmem [shape: f32[16,2,1,128], index: 0, kind: input, shape index: {}]   ;;  %s1493_s1 = inlined_call_operand.vmem [shape: s32[2,1,128], index: 1, kind: input, shape index: {}]   ;;  %s1494_s2 = inlined_call_operand.vmem [shape: f32[16,2,1,128], index: 2, kind: output, shape index: {}]  }
   0x1   :  { %s1184_s11 = smov 0   ;;  %s1186_s12 = smov 0  }
   0x2   :  { %s1188_s13 = smov 0   ;;  %s1190_s14 = smov 0  }
   0x3   :  { %s1192_s15 = smov 0  }
   0x4 LB: > { %s912_s16 = sadd.s32 4294967295, %s1161_s15   ;;  %s24_s17 = sadd.s32 1, %s1157_s14  ;;  %s1161_s15 = sphi %s1192_s15, %s12_s15   ;;  %s1157_s14 = sphi %s1190_s14, %s1511_s14   ;;  %s1153_s13 = sphi %s1188_s13, %s1510_s13   ;;  %s1149_s12 = sphi %s1186_s12, %s1509_s12   ;;  %s1145_s11 = sphi %s1184_s11, %s1508_s11   ;;  %s1141_s10 = sphi %s1182_s10, %s1507_s10   ;;  %s1137_s9 = sphi %s1180_s9, %s1506_s9  }
   0x5   : > { %p26_p0 = scmp.ge.s32.totalorder %s24_s17, 2  ;;  %p28_p1 = scmp.lt.s32.totalorder %s1157_s14, 1 }
   0x6   : > { %s37_s18 = sadd.s32 1, %s1149_s12  ;;  %p44_p2 = scmp.ne.s32.totalorder %s1149_s12, %s1145_s11 }
   0x7   : > { %s1513_s17 = smov (%p26_p0, %s24_s17), 0  ;;  %p45_p4 = scmp.eq.s32.totalorder %s1161_s15, 0 }
   0x8   : > { %s29_s19 = scalar_select %p28_p1, %s1157_s14, 1 }
   0x9   : > { %p30_p3 = scmp.lt.s32.totalorder %s1513_s17, 1  ;;  %s87_s20 = ssub.s32 %s1157_s14, %s1513_s17 }
   0xa   : > { %s91_s21 = sadd.s32 1, %s1141_s10  ;;  %p46_p5 = por %p45_p4, %p44_p2 }
   0xb   : > { %s31_s22 = scalar_select %p30_p3, %s1513_s17, 1 }
   0xc   : > { %p89_p6 = scmp.eq.s32.totalorder %s87_s20, 0  ;;  %p101_p7 = scmp.ne.s32.totalorder %s1141_s10, %s1137_s9 }
   0xd   : > { %s33_s23 = ssub.s32 %s29_s19, %s31_s22  ;;  %p102_p9 = scmp.eq.s32.totalorder %s912_s16, 1 }
   0xe   : > { %p35_p8 = scmp.eq.s32.totalorder %s33_s23, 0  ;;  %p915_p11 = scmp.ge.s32.totalorder %s1161_s15, 2 }
   0xf   : > { %s1233_s24 = scalar_select %p89_p6, %s1141_s10, %s91_s21  }
  0x10   : > { %s1236_s25 = scalar_select %p35_p8, %s1149_s12, %s37_s18  }
  0x11   : > { %p1238_p10 = por %p102_p9, %p101_p7  ;;  %124 = sbr.rel (%p915_p11) target bundleno = 38 (0x26), region = 16 }
  0x18   : > { %127 = sbr.rel (!%p46_p5) target bundleno = 38 (0x26), region = 20  ;;  %s129_s27 = sand.u32 (%p46_p5), 1, %s1149_s12  }
  0x19   : > { %s1247_s30 = scalar_lea.vmem (%p46_p5), %s1492_s0, %s29_s19  ;;  %s916_s3 = sshll.u32 (%p46_p5), %s129_s27, 4 }
  0x1a   : > { %v153_v0 = vld [vmem:[%s1247_s30] sm:$0x1] (%p46_p5)  ;;  %v155_v1 = vld [vmem:[%s1247_s30 + $0x2] sm:$0x1] (%p46_p5)  ;;  %v157_v2 = vld [vmem:[%s1247_s30 + $0x4] sm:$0x1] (%p46_p5) }
  0x1b   : > { %v159_v3 = vld [vmem:[%s1247_s30 + $0x6] sm:$0x1] (%p46_p5)  ;;  %s131_s4 = scalar_lea.vmem (%p46_p5), [#allocation3], %s916_s3  ;;  %v161_v4 = vld [vmem:[%s1247_s30 + $0x8] sm:$0x1] (%p46_p5) }
  0x1c   : > { %154 = vst [vmem:[%s131_s4] sm:$0x1] (%p46_p5), %v153_v0  ;;  %156 = vst [vmem:[%s131_s4 + $0x1] sm:$0x1] (%p46_p5), %v155_v1  ;;  %v163_v5 = vld [vmem:[%s1247_s30 + $0xa] sm:$0x1] (%p46_p5) }
  0x1d   : > { %158 = vst [vmem:[%s131_s4 + $0x2] sm:$0x1] (%p46_p5), %v157_v2  ;;  %160 = vst [vmem:[%s131_s4 + $0x3] sm:$0x1] (%p46_p5), %v159_v3  ;;  %v165_v6 = vld [vmem:[%s1247_s30 + $0xc] sm:$0x1] (%p46_p5) }
  0x1e   : > { %162 = vst [vmem:[%s131_s4 + $0x4] sm:$0x1] (%p46_p5), %v161_v4  ;;  %164 = vst [vmem:[%s131_s4 + $0x5] sm:$0x1] (%p46_p5), %v163_v5  ;;  %v167_v7 = vld [vmem:[%s1247_s30 + $0xe] sm:$0x1] (%p46_p5) }
  0x1f   : > { %166 = vst [vmem:[%s131_s4 + $0x6] sm:$0x1] %v165_v6  ;;  %v169_v8 = vld [vmem:[%s1247_s30 + $0x10] sm:$0x1]  ;;  %v171_v9 = vld [vmem:[%s1247_s30 + $0x12] sm:$0x1] }
  0x20   : > { %168 = vst [vmem:[%s131_s4 + $0x7] sm:$0x1] %v167_v7  ;;  %170 = vst [vmem:[%s131_s4 + $0x8] sm:$0x1] %v169_v8  ;;  %v173_v10 = vld [vmem:[%s1247_s30 + $0x14] sm:$0x1] }
  0x21   : > { %172 = vst [vmem:[%s131_s4 + $0x9] sm:$0x1] %v171_v9  ;;  %v175_v11 = vld [vmem:[%s1247_s30 + $0x16] sm:$0x1]  ;;  %v177_v12 = vld [vmem:[%s1247_s30 + $0x18] sm:$0x1] }
  0x22   : > { %174 = vst [vmem:[%s131_s4 + $0xa] sm:$0x1] %v173_v10  ;;  %176 = vst [vmem:[%s131_s4 + $0xb] sm:$0x1] %v175_v11  ;;  %v179_v13 = vld [vmem:[%s1247_s30 + $0x1a] sm:$0x1] }
  0x23   : > { %178 = vst [vmem:[%s131_s4 + $0xc] sm:$0x1] %v177_v12  ;;  %v181_v14 = vld [vmem:[%s1247_s30 + $0x1c] sm:$0x1]  ;;  %v183_v15 = vld [vmem:[%s1247_s30 + $0x1e] sm:$0x1] }
  0x24   : > { %180 = vst [vmem:[%s131_s4 + $0xd] sm:$0x1] %v179_v13  ;;  %182 = vst [vmem:[%s131_s4 + $0xe] sm:$0x1] %v181_v14 }
  0x25   : > { %184 = vst [vmem:[%s131_s4 + $0xf] sm:$0x1] %v183_v15 }
  0x26 PF: > { %p917_p12 = scmp.ge.s32.totalorder %s1161_s15, 1  ;;  %p244_p13 = scmp.lt.s32.totalorder %s1161_s15, 3 }
  0x28   : > { %p245_p0 = pnand %p917_p12, %p244_p13 }
  0x29   : > { %p277_p1 = scmp.lt.s32.totalorder (!%p245_p0), %s1153_s13, 1  ;;  %v285_v16 = vlaneseq (!%p245_p0)  ;;  %s251_s5 = sand.u32 (!%p245_p0), 1, %s1145_s11   ;;  %v1163_v18 = vmov (!%p245_p0), 1966171168   ;;  %v1164_v31 = vmov (!%p245_p0), 1.0|1.0  }
  0x2a   : > { %248 = sbr.rel (%p245_p0) target bundleno = 322 (0x142), region = 65  ;;  %s918_s6 = sshll.u32 (!%p245_p0), %s251_s5, 4  ;;  %v424_v19 = vunpack.c.l.s4 (!%p245_p0), %v1163_v18 }
  0x2b   : > { %v1270_v17 = vshrl.u32 (!%p245_p0), %v285_v16, 7  ;;  %s1287_s11 = scalar_lea.vmem (!%p245_p0), [#allocation3], %s918_s6  ;;  %s271_s19 = sand.u32 (!%p245_p0), 1, %s1137_s9  }
  0x2c   : > { %v371_v26 = vld [vmem:[%s1287_s11] sm:$0x1] (!%p245_p0)  ;;  %v372_v29 = vld [vmem:[%s1287_s11 + $0x1] sm:$0x1] (!%p245_p0)  ;;  %v373_v30 = vld [vmem:[%s1287_s11 + $0x2] sm:$0x1] (!%p245_p0)  ;;  %v425_v35 = vunpack.c.0.s8 (!%p245_p0), %v424_v19 }
  0x2d   : > { %v287_v20 = vadd.s32 (!%p245_p0), 8, %v1270_v17  ;;  %v288_v21 = vadd.s32 (!%p245_p0), 16, %v1270_v17  ;;  %v289_v22 = vadd.s32 (!%p245_p0), 24, %v1270_v17  ;;  %v290_v23 = vadd.s32 (!%p245_p0), 32, %v1270_v17  ;;  %v374_v33 = vld [vmem:[%s1287_s11 + $0x3] sm:$0x1] (!%p245_p0) }
  0x2e   : > { %v291_v25 = vadd.s32 (!%p245_p0), 40, %v1270_v17  ;;  %v292_v27 = vadd.s32 (!%p245_p0), 48, %v1270_v17  ;;  %v293_v28 = vadd.s32 (!%p245_p0), 56, %v1270_v17  ;;  %v375_v34 = vld [vmem:[%s1287_s11 + $0x4] sm:$0x1] (!%p245_p0)  ;;  %v419_v39 = vcombine.low (!%p245_p0), %v371_v26, %v372_v29  ;;  %s919_s20 = sshll.u32 (!%p245_p0), %s271_s19, 4 }
  0x2f   : > { %v376_v36 = vld [vmem:[%s1287_s11 + $0x5] sm:$0x1] (!%p245_p0)  ;;  %v377_v37 = vld [vmem:[%s1287_s11 + $0x6] sm:$0x1] (!%p245_p0)  ;;  %v378_v38 = vld [vmem:[%s1287_s11 + $0x7] sm:$0x1] (!%p245_p0)  ;;  %v420_v43 = vcombine.low (!%p245_p0), %v373_v30, %v374_v33  ;;  %v1319_v46 = vsub.s32 (!%p245_p0), %v425_v35, %v1270_v17 }
  0x30   : > { %v294_v41 = vadd.s32 (!%p245_p0), 64, %v1270_v17  ;;  %v295_v42 = vadd.s32 (!%p245_p0), 72, %v1270_v17  ;;  %v421_v44 = vcombine.low (!%p245_p0), %v375_v34, %v376_v36  ;;  %v422_v45 = vcombine.low (!%p245_p0), %v377_v37, %v378_v38  ;;  %v379_v54 = vld [vmem:[%s1287_s11 + $0x8] sm:$0x1] (!%p245_p0)  ;;  %v380_v55 = vld [vmem:[%s1287_s11 + $0x9] sm:$0x1] (!%p245_p0) }
  0x31   : > { %s278_s7 = scalar_select %p277_p1, %s1153_s13, 1  ;;  %v429_v47 = vrot.slane %v419_v39, %v1319_v46  ;;  %v436_v48 = vrot.slane %v420_v43, %v1319_v46  ;;  %v296_v52 = vadd.s32 80, %v1270_v17  ;;  %v297_v53 = vadd.s32 88, %v1270_v17  ;;  %v381_v58 = vld [vmem:[%s1287_s11 + $0xa] sm:$0x1] }
  0x32   : > { %v443_v49 = vrot.slane %v421_v44, %v1319_v46  ;;  %v450_v50 = vrot.slane %v422_v45, %v1319_v46  ;;  %v382_v59 = vld [vmem:[%s1287_s11 + $0xb] sm:$0x1]  ;;  %v383_v60 = vld [vmem:[%s1287_s11 + $0xc] sm:$0x1]  ;;  %v384_v61 = vld [vmem:[%s1287_s11 + $0xd] sm:$0x1]  ;;  %v468_v5 = vcombine.low %v379_v54, %v380_v55  ;;  %s1437_s23 = scalar_lea.vmem (%p1238_p10), %s1494_s2, %s1153_s13 }
  0x33   : > { %s279_s18 = scalar_lea.vmem %s1493_s1, %s278_s7  ;;  %v451_v56 = vcombine.low %v429_v47, %v436_v48  ;;  %v385_v62 = vld [vmem:[%s1287_s11 + $0xe] sm:$0x1]  ;;  %v386_v63 = vld [vmem:[%s1287_s11 + $0xf] sm:$0x1]  ;;  %v298_v0 = vadd.s32 96, %v1270_v17  ;;  %v299_v4 = vadd.s32 104, %v1270_v17  ;;  %v469_v7 = vcombine.low %v381_v58, %v382_v59 }
  0x34   : > { %v1279_v24 = vld [vmem:[%s279_s18] ss:$0 sm:$0xff]  ;;  %v452_v57 = vcombine.low %v443_v49, %v450_v50  ;;  %v470_v8 = vcombine.low %v383_v60, %v384_v61  ;;  %v471_v9 = vcombine.low %v385_v62, %v386_v63  ;;  %v300_v11 = vadd.s32 112, %v1270_v17  ;;  %s1405_s21 = scalar_lea.vmem [#allocation4], %s919_s20 }
  0x35   : > { %vm307_vm0 = vcmp.eq.s32.totalorder %v1270_v17, %v1279_v24  ;;  %vm308_vm1 = vcmp.eq.s32.totalorder %v287_v20, %v1279_v24  ;;  %vm309_vm2 = vcmp.eq.s32.totalorder %v288_v21, %v1279_v24  ;;  %vm310_vm3 = vcmp.eq.s32.totalorder %v289_v22, %v1279_v24 }
  0x36   : > { %vm1017_vm4 = vmpackc.low %vm308_vm1, %vm307_vm0  ;;  %vm311_vm6 = vcmp.eq.s32.totalorder %v290_v23, %v1279_v24  ;;  %vm312_vm7 = vcmp.eq.s32.totalorder %v291_v25, %v1279_v24  ;;  %vm313_vm9 = vcmp.eq.s32.totalorder %v292_v27, %v1279_v24  ;;  %vm314_vm10 = vcmp.eq.s32.totalorder %v293_v28, %v1279_v24 }
  0x37   : > { %1018 = vmatprep.subr.msk.bf16.mxu0 %vm1017_vm4, %v1164_v31  ;;  %vm1295_vm5 = vmpackc.low %vm310_vm3, %vm309_vm2  ;;  %vm315_vm12 = vcmp.eq.s32.totalorder %v294_v41, %v1279_v24  ;;  %vm316_vm13 = vcmp.eq.s32.totalorder %v295_v42, %v1279_v24  ;;  %v459_v1 = vrot.slane %v451_v56, %v1319_v46  ;;  %v466_v2 = vrot.slane %v452_v57, %v1319_v46 }
  0x38   : > { %1020 = vmatpush3.bf16.msk.msra.mxu0 %vm1017_vm4, %v1164_v31  ;;  %vm1310_vm8 = vmpackc.low %vm312_vm7, %vm311_vm6  ;;  %vm317_vm15 = vcmp.eq.s32.totalorder %v296_v52, %v1279_v24  ;;  %vm318_vm0 = vcmp.eq.s32.totalorder %v297_v53, %v1279_v24  ;;  %vm319_vm2 = vcmp.eq.s32.totalorder %v298_v0, %v1279_v24  ;;  %vm320_vm3 = vcmp.eq.s32.totalorder %v299_v4, %v1279_v24 }
  0x39   : > { %1022 = vmatprep.subr.msk.bf16.mxu0 %vm1295_vm5, %v1164_v31  ;;  %vm1331_vm11 = vmpackc.low %vm314_vm10, %vm313_vm9  ;;  %v467_v6 = vcombine.low %v459_v1, %v466_v2  ;;  %v301_v12 = vadd.s32 120, %v1270_v17  ;;  %v478_v13 = vrot.slane %v468_v5, %v1319_v46  ;;  %v485_v14 = vrot.slane %v469_v7, %v1319_v46 }
  0x3a   : > { %vm1358_vm14 = vmpackc.low %vm316_vm13, %vm315_vm12  ;;  %v492_v15 = vrot.slane %v470_v8, %v1319_v46  ;;  %v499_v16 = vrot.slane %v471_v9, %v1319_v46 }
  0x3b   : > { %1014 = vmatprep.mubr.f32.mxu0 %v467_v6  ;;  %vm1371_vm1 = vmpackc.low %vm318_vm0, %vm317_vm15  ;;  %vm322_vm6 = vcmp.eq.s32.totalorder %v301_v12, %v1279_v24  ;;  %v500_v17 = vcombine.low %v478_v13, %v485_v14 }
  0x3c   : > { %1024 = vmatpush3.bf16.msk.msra.mxu0 %vm1295_vm5, %v1164_v31  ;;  %vm1041_vm4 = vmpackc.low %vm320_vm3, %vm319_vm2  ;;  %vm321_vm5 = vcmp.eq.s32.totalorder %v300_v11, %v1279_v24  ;;  %v501_v18 = vcombine.low %v492_v15, %v499_v16 }
  0x3d   : > { %1026 = vmatprep.subr.msk.bf16.mxu0 %vm1310_vm8, %v1164_v31  ;;  %vm1045_vm7 = vmpackc.low %vm322_vm6, %vm321_vm5  ;;  %v508_v19 = vrot.slane %v500_v17, %v1319_v46 }
  0x3e   : > { %v515_v20 = vrot.slane %v501_v18, %v1319_v46 }
  0x40   : > { %1028 = vmatpush3.bf16.msk.msra.mxu0 %vm1310_vm8, %v1164_v31  ;;  %v516_v21 = vcombine.low %v508_v19, %v515_v20 }
  0x41   : > { %1030 = vmatprep.subr.msk.bf16.mxu0 %vm1331_vm11, %v1164_v31 }
  0x44   : > { %1032 = vmatpush3.bf16.msk.msra.mxu0 %vm1331_vm11, %v1164_v31 }
  0x45   : > { %1034 = vmatprep.subr.msk.bf16.mxu0 %vm1358_vm14, %v1164_v31 }
  0x48   : > { %1036 = vmatpush3.bf16.msk.msra.mxu0 %vm1358_vm14, %v1164_v31 }
  0x49   : > { %1038 = vmatprep.subr.msk.bf16.mxu0 %vm1371_vm1, %v1164_v31 }
  0x4c   : > { %1040 = vmatpush3.bf16.msk.msra.mxu0 %vm1371_vm1, %v1164_v31 }
  0x4d   : > { %1042 = vmatprep.subr.msk.bf16.mxu0 %vm1041_vm4, %v1164_v31 }
  0x50   : > { %1044 = vmatpush3.bf16.msk.msra.mxu0 %vm1041_vm4, %v1164_v31 }
  0x51   : > { %1046 = vmatprep.subr.msk.bf16.mxu0 %vm1045_vm7, %v1164_v31 }
  0x54   : > { %1048 = vmatpush3.bf16.msk.msra.mxu0 %vm1045_vm7, %v1164_v31 }
  0x57   : > { %1015 = vmatmul.mubr.f32.vlgmr.msra.gmra.mrb[0].mxu0 %v516_v21 }
 0x12a   : > { %v1016_v22 = vpop.f32.mrb[0].mxu0 }
 0x12b   : > { %v645_v23 = vcombine.high %v1016_v22, %v1016_v22  ;;  %v652_v24 = vrot.slane %v1016_v22, %v1319_v46  ;;  %v585_v25 = vpop.f32.mrb[1].mxu0 }
 0x12c   : > { %v596_v26 = vcombine.high %v585_v25, %v585_v25  ;;  %v603_v27 = vrot.slane %v585_v25, %v1319_v46 }
 0x12d   : > { %v659_v28 = vrot.slane %v645_v23, %v1319_v46  ;;  %v660_v29 = vcombine.high %v652_v24, %v652_v24  ;;  %v668_v30 = vrot.slane %v652_v24, %v1319_v46  ;;  %941 = vst.sshfl [vmem:[%s1405_s21 + $0x8] sm:$0x1 pattern:$0x73625140] %v652_v24 }
 0x12e   : > { %v610_v31 = vrot.slane %v596_v26, %v1319_v46  ;;  %v611_v32 = vcombine.high %v603_v27, %v603_v27  ;;  %v619_v33 = vrot.slane %v603_v27, %v1319_v46  ;;  %937 = vst.sshfl [vmem:[%s1405_s21] sm:$0x1 pattern:$0x73625140] %v603_v27 }
 0x12f   : > { %v661_v34 = vcombine.high %v659_v28, %v659_v28  ;;  %v675_v35 = vrot.slane %v659_v28, %v1319_v46  ;;  %v682_v36 = vrot.slane %v660_v29, %v1319_v46  ;;  %v690_v37 = vcombine.high %v668_v30, %v668_v30  ;;  %942 = vst.sshfl [vmem:[%s1405_s21 + $0x9] sm:$0x1 pattern:$0x73625140] %v660_v29 }
 0x130   : > { %943 = vst.sshfl [vmem:[%s1405_s21 + $0xc] sm:$0x1 pattern:$0x73625140] %v659_v28  ;;  %v612_v38 = vcombine.high %v610_v31, %v610_v31  ;;  %v626_v39 = vrot.slane %v610_v31, %v1319_v46  ;;  %v633_v40 = vrot.slane %v611_v32, %v1319_v46  ;;  %v641_v41 = vcombine.high %v619_v33, %v619_v33  ;;  %732 = sbr.rel (!%p1238_p10) target bundleno = 322 (0x142), region = 77 }
 0x131   : > { %938 = vst.sshfl [vmem:[%s1405_s21 + $0x1] sm:$0x1 pattern:$0x73625140] %v611_v32  ;;  %v689_v42 = vrot.slane %v661_v34, %v1319_v46  ;;  %v691_v43 = vcombine.high %v675_v35, %v675_v35  ;;  %v692_v44 = vcombine.high %v682_v36, %v682_v36  ;;  %720 = vst [vmem:[%s1405_s21 + $0xa] sm:$0x1] %v690_v37 }
 0x132   : > { %939 = vst.sshfl [vmem:[%s1405_s21 + $0x4] sm:$0x1 pattern:$0x73625140] %v610_v31  ;;  %v640_v45 = vrot.slane %v612_v38, %v1319_v46  ;;  %v642_v47 = vcombine.high %v626_v39, %v626_v39  ;;  %v643_v48 = vcombine.high %v633_v40, %v633_v40  ;;  %712 = vst [vmem:[%s1405_s21 + $0x2] sm:$0x1] %v641_v41 }
 0x133   : > { %944 = vst.sshfl [vmem:[%s1405_s21 + $0xd] sm:$0x1 pattern:$0x73625140] %v661_v34  ;;  %v693_v49 = vcombine.high %v689_v42, %v689_v42  ;;  %721 = vst [vmem:[%s1405_s21 + $0xb] sm:$0x1] %v692_v44 }
 0x134   : > { %940 = vst.sshfl [vmem:[%s1405_s21 + $0x5] sm:$0x1 pattern:$0x73625140] %v612_v38  ;;  %724 = vst [vmem:[%s1405_s21 + $0xe] sm:$0x1] %v691_v43  ;;  %v644_v50 = vcombine.high %v640_v45, %v640_v45 }
 0x135   : > { %713 = vst [vmem:[%s1405_s21 + $0x3] sm:$0x1] %v643_v48  ;;  %716 = vst [vmem:[%s1405_s21 + $0x6] sm:$0x1] %v642_v47  ;;  %v752_v46 = vld [vmem:[%s1405_s21] sm:$0x1] (%p1238_p10) }
 0x136   : > { %725 = vst [vmem:[%s1405_s21 + $0xf] sm:$0x1] %v693_v49  ;;  %717 = vst [vmem:[%s1405_s21 + $0x7] sm:$0x1] %v644_v50  ;;  %v768_v58 = vld [vmem:[%s1405_s21 + $0x8] sm:$0x1] (%p1238_p10) }
 0x137   : > { %753 = vst [vmem:[%s1437_s23] sm:$0x1] %v752_v46  ;;  %769 = vst [vmem:[%s1437_s23 + $0x10] sm:$0x1] %v768_v58  ;;  %v770_v59 = vld [vmem:[%s1405_s21 + $0x9] sm:$0x1] }
 0x138   : > { %v754_v51 = vld [vmem:[%s1405_s21 + $0x1] sm:$0x1]  ;;  %v772_v60 = vld [vmem:[%s1405_s21 + $0xa] sm:$0x1]  ;;  %771 = vst [vmem:[%s1437_s23 + $0x12] sm:$0x1] %v770_v59 }
 0x139   : > { %v756_v52 = vld [vmem:[%s1405_s21 + $0x2] sm:$0x1]  ;;  %755 = vst [vmem:[%s1437_s23 + $0x2] sm:$0x1] %v754_v51  ;;  %v760_v54 = vld [vmem:[%s1405_s21 + $0x4] sm:$0x1] }
 0x13a   : > { %757 = vst [vmem:[%s1437_s23 + $0x4] sm:$0x1] %v756_v52  ;;  %761 = vst [vmem:[%s1437_s23 + $0x8] sm:$0x1] %v760_v54  ;;  %v774_v61 = vld [vmem:[%s1405_s21 + $0xb] sm:$0x1] }
 0x13b   : > { %v762_v55 = vld [vmem:[%s1405_s21 + $0x5] sm:$0x1]  ;;  %773 = vst [vmem:[%s1437_s23 + $0x14] sm:$0x1] %v772_v60  ;;  %775 = vst [vmem:[%s1437_s23 + $0x16] sm:$0x1] %v774_v61 }
 0x13c   : > { %v758_v53 = vld [vmem:[%s1405_s21 + $0x3] sm:$0x1]  ;;  %763 = vst [vmem:[%s1437_s23 + $0xa] sm:$0x1] %v762_v55  ;;  %v764_v56 = vld [vmem:[%s1405_s21 + $0x6] sm:$0x1] }
 0x13d   : > { %759 = vst [vmem:[%s1437_s23 + $0x6] sm:$0x1] %v758_v53  ;;  %v766_v57 = vld [vmem:[%s1405_s21 + $0x7] sm:$0x1]  ;;  %765 = vst [vmem:[%s1437_s23 + $0xc] sm:$0x1] %v764_v56 }
 0x13e   : > { %767 = vst [vmem:[%s1437_s23 + $0xe] sm:$0x1] %v766_v57  ;;  %v776_v62 = vld [vmem:[%s1405_s21 + $0xc] sm:$0x1]  ;;  %v778_v63 = vld [vmem:[%s1405_s21 + $0xd] sm:$0x1] }
 0x13f   : > { %v780_v0 = vld [vmem:[%s1405_s21 + $0xe] sm:$0x1]  ;;  %777 = vst [vmem:[%s1437_s23 + $0x18] sm:$0x1] %v776_v62  ;;  %779 = vst [vmem:[%s1437_s23 + $0x1a] sm:$0x1] %v778_v63 }
 0x140   : > { %781 = vst [vmem:[%s1437_s23 + $0x1c] sm:$0x1] %v780_v0  ;;  %v782_v1 = vld [vmem:[%s1405_s21 + $0xf] sm:$0x1] }
 0x141   : > { %783 = vst [vmem:[%s1437_s23 + $0x1e] sm:$0x1] %v782_v1 }
 0x142 PF: > { %s12_s15 = sadd.s32 1, %s1161_s15   ;;  %s1506_s9 = smov %s1141_s10 }
 0x143   : > { %p9_p2 = scmp.ge.s32.totalorder %s12_s15, 4   ;;  %s1507_s10 = smov %s1233_s24 }
 0x144   : > { %s1508_s11 = smov %s1149_s12  ;;  %s1509_s12 = smov %s1236_s25 }
 0x145   : > { %s1510_s13 = smov %s1157_s14  ;;  %s1511_s14 = smov %s1513_s17 }
 0x146   :  { %11 = sbr.rel (!%p9_p2) target bundleno = 4 (0x4), region = 152 }

</bundles_post_ra>
